<compile_context>
chip_gen: v5e
topology: v5e:2x2
jax: 0.10.0
libtpu: 0.0.40
codegen_flags: <defaults>
</compile_context>

<pallas_src>
import functools

import jax
import jax.numpy as jnp
from jax.experimental import pallas as pl
from jax.experimental.pallas import tpu as pltpu


def _round_up(x, m):
    return ((x + m - 1) // m) * m


# ----------------------------- Pallas kernel ---------------------------------
def dqn_policy_kernel(x_ref, w_ref, b_ref, out_ref, *, d_in, action_size):
    """x_ref: [TB, d_in]; w_ref: [4, PD, PD]; b_ref: [4, PD]; out_ref: [TB, action_size]."""
    x = x_ref[...]                                   # [TB, d_in] f32
    b = b_ref[...]                                   # [4, PD]    f32

    # fused encoders: relu(x @ blockdiag(W_self, W_stat, W_dyn) + b_enc)
    # contract against only the top d_in (sublane-aligned) rows of the padded weight
    f = jnp.maximum(
        jnp.dot(x, w_ref[0, :d_in, :], preferred_element_type=jnp.float32)
        + b[0:1, :], 0.0)
    # hidden layer 1
    h1 = jnp.maximum(
        jnp.dot(f, w_ref[1], preferred_element_type=jnp.float32) + b[1:2, :], 0.0)
    # hidden layer 2
    h2 = jnp.maximum(
        jnp.dot(h1, w_ref[2], preferred_element_type=jnp.float32) + b[2:3, :], 0.0)
    # output layer (no activation); store only the real action columns
    out = jnp.dot(h2, w_ref[3], preferred_element_type=jnp.float32) + b[3:4, :]

    out_ref[...] = out[:, :action_size].astype(out_ref.dtype)


# ------------------------- parameter packing (once) ---------------------------
def pack_params(params):
    """Fuse encoders into a block-diagonal layer, zero-pad every layer to a
    common [PD, PD] square, and pack into (w_pack [4,PD,PD], b_pack [4,PD])."""
    (w_self, b_self, w_stat, b_stat, w_dyn, b_dyn,
     w_h1, b_h1, w_h2, b_h2, w_out, b_out) = params

    # biases must be row vectors (1, fan_out)
    for w, b in ((w_self, b_self), (w_stat, b_stat), (w_dyn, b_dyn),
                 (w_h1, b_h1), (w_h2, b_h2), (w_out, b_out)):
        assert b.shape == (1, w.shape[1]), "bias must have shape (1, fan_out)"

    self_dim, self_feat = w_self.shape
    static_dim, static_feat = w_stat.shape
    dynamic_dim, dynamic_feat = w_dyn.shape
    d_in = self_dim + static_dim + dynamic_dim
    f_cat = self_feat + static_feat + dynamic_feat
    hidden = w_h1.shape[1]
    action_size = w_out.shape[1]

    # block-diagonal fused encoder weight / concatenated bias (exact)
    w_enc = jnp.zeros((d_in, f_cat), jnp.float32)
    w_enc = w_enc.at[:self_dim, :self_feat].set(w_self)
    w_enc = w_enc.at[self_dim:self_dim + static_dim,
                     self_feat:self_feat + static_feat].set(w_stat)
    w_enc = w_enc.at[self_dim + static_dim:,
                     self_feat + static_feat:].set(w_dyn)
    b_enc = jnp.concatenate([b_self, b_stat, b_dyn], axis=1)       # [1, f_cat]

    # common padded square so every layer's padded-N matches the next padded-K
    pd = _round_up(max(d_in, f_cat, hidden, action_size, 128), 128)

    def pad_w(w):
        return jnp.zeros((pd, pd), jnp.float32).at[:w.shape[0], :w.shape[1]].set(w)

    def pad_b(b):
        return jnp.zeros((pd,), jnp.float32).at[:b.shape[1]].set(b[0])

    w_pack = jnp.stack([pad_w(w_enc), pad_w(w_h1), pad_w(w_h2), pad_w(w_out)])
    b_pack = jnp.stack([pad_b(b_enc), pad_b(b_h1), pad_b(b_h2), pad_b(b_out)])
    return w_pack, b_pack, action_size


# ------------------------------ wrapper ---------------------------------------
def dqn_policy_forward(x, w_pack, b_pack, action_size, *, max_tile_b=1024):
    """x: [B, d_in] f32 -> [B, action_size] f32."""
    B, d_in = x.shape
    pd = w_pack.shape[-1]
    d_in_pad = _round_up(d_in, 8)                    # sublane-aligned weight slice
    assert d_in_pad <= pd

    # batch tiling: multiple of 8, <= max_tile_b, and aim for >=2 grid steps
    # (so the "parallel" axis actually shards across both TCs on v7x)
    rows = _round_up(max(B, 1), 8)
    tile_b = min(max_tile_b, max(8, _round_up(pl.cdiv(rows, 2), 8)))
    b_pad = _round_up(rows, tile_b)

    # pad only batch rows (and at most 7 feature columns); exact under ReLU
    if b_pad != B or d_in_pad != d_in:
        x_p = jnp.zeros((b_pad, d_in_pad), jnp.float32).at[:B, :d_in].set(x)
    else:
        x_p = x

    grid = (b_pad // tile_b,)

    kernel = functools.partial(dqn_policy_kernel,
                               d_in=d_in_pad, action_size=action_size)

    flops = 2 * b_pad * pd * (d_in_pad + 3 * pd)
    bytes_accessed = 4 * (b_pad * d_in_pad + int(w_pack.size) + int(b_pack.size)
                          + b_pad * action_size)

    out = pl.pallas_call(
        kernel,
        out_shape=jax.ShapeDtypeStruct((b_pad, action_size), jnp.float32),
        grid=grid,
        in_specs=[
            pl.BlockSpec((tile_b, d_in_pad), lambda i: (i, 0)),   # x tile (natural width)
            pl.BlockSpec((4, pd, pd), lambda i: (0, 0, 0)),       # packed weights (resident)
            pl.BlockSpec((4, pd), lambda i: (0, 0)),              # packed biases  (resident)
        ],
        out_specs=pl.BlockSpec((tile_b, action_size), lambda i: (i, 0)),
        compiler_params=pltpu.CompilerParams(
            dimension_semantics=("parallel",)),
        cost_estimate=pl.CostEstimate(flops=flops, transcendentals=0,
                                      bytes_accessed=bytes_accessed),
    )(x_p, w_pack, b_pack)

    return out[:B, :]


# ------------------------- deterministic param init ---------------------------
def init_params(key, self_dim, static_dim, dynamic_dim,
                self_feat, static_feat, dynamic_feat, hidden, action_size):
    def linear(key, fan_in, fan_out):
        kw, kb = jax.random.split(key)
        bound = 1.0 / jnp.sqrt(fan_in)
        w = jax.random.uniform(kw, (fan_in, fan_out), jnp.float32, -bound, bound)
        b = jax.random.uniform(kb, (1, fan_out), jnp.float32, -bound, bound)
        return w, b

    keys = jax.random.split(key, 6)
    concat = self_feat + static_feat + dynamic_feat
    w_self, b_self = linear(keys[0], self_dim, self_feat)
    w_stat, b_stat = linear(keys[1], static_dim, static_feat)
    w_dyn, b_dyn = linear(keys[2], dynamic_dim, dynamic_feat)
    w_h1, b_h1 = linear(keys[3], concat, hidden)
    w_h2, b_h2 = linear(keys[4], hidden, hidden)
    w_out, b_out = linear(keys[5], hidden, action_size)
    return (w_self, b_self, w_stat, b_stat, w_dyn, b_dyn,
            w_h1, b_h1, w_h2, b_h2, w_out, b_out)


# ------------------------------ reference -------------------------------------
def reference_forward(x, params, dims):
    (w_self, b_self, w_stat, b_stat, w_dyn, b_dyn,
     w_h1, b_h1, w_h2, b_h2, w_out, b_out) = params
    self_dim, static_dim, dynamic_dim = dims
    s = x[:, :self_dim]
    st = x[:, self_dim:self_dim + static_dim]
    dy = x[:, self_dim + static_dim:]
    f = jnp.concatenate([
        jax.nn.relu(s @ w_self + b_self),
        jax.nn.relu(st @ w_stat + b_stat),
        jax.nn.relu(dy @ w_dyn + b_dyn)], axis=1)
    f = jax.nn.relu(f @ w_h1 + b_h1)
    f = jax.nn.relu(f @ w_h2 + b_h2)
    return f @ w_out + b_out


if __name__ == "__main__":
    # Small shapes consistent with the module's forward.
    B = 4
    self_dim, static_dim, dynamic_dim = 4, 6, 6            # input = 16 features
    self_feat, static_feat, dynamic_feat = 8, 8, 16        # concat = 32
    hidden = 32
    action_size = 8

    key = jax.random.PRNGKey(0)
    kx, kp = jax.random.split(key)
    x = jax.random.normal(kx, (B, self_dim + static_dim + dynamic_dim), jnp.float32)
    params = init_params(kp, self_dim, static_dim, dynamic_dim,
                         self_feat, static_feat, dynamic_feat, hidden, action_size)
    dims = (self_dim, static_dim, dynamic_dim)

    # one-time packing (block-diag encoder fusion + (8,128)-padded packing)
    w_pack, b_pack, a_size = pack_params(params)

    out = dqn_policy_forward(x, w_pack, b_pack, a_size)
    out = jax.block_until_ready(out)

    ref = reference_forward(x, params, dims)
    assert out.shape == (B, action_size)
    assert jnp.allclose(out, ref, atol=1e-5, rtol=1e-5), "mismatch vs reference"

    print("KERNEL_OK")
</pallas_src>

<mosaic_0001>
module attributes {stable_mosaic.version = 11 : i64} {
  func.func @dqn_policy_kernel(%arg0: i32, %arg1: memref<8x16xf32, #tpu.memory_space<vmem>>, %arg2: memref<4x128x128xf32, #tpu.memory_space<vmem>>, %arg3: memref<4x128xf32, #tpu.memory_space<vmem>>, %arg4: memref<8x8xf32, #tpu.memory_space<vmem>>) attributes {dimension_semantics = [#tpu.dimension_semantics<parallel>], iteration_bounds = array<i64: 1>, scalar_prefetch = 0 : i64, scratch_operands = 0 : i64, tpu.core_type = #tpu.core_type<tc>, window_params = [{transform_indices = @transform_0, window_bounds = array<i64: 8, 16>}, {pipeline_mode = #tpu.pipeline_mode<synchronous>, transform_indices = @transform_1, window_bounds = array<i64: 4, 128, 128>}, {pipeline_mode = #tpu.pipeline_mode<synchronous>, transform_indices = @transform_2, window_bounds = array<i64: 4, 128>}, {transform_indices = @transform_3, window_bounds = array<i64: 8, 8>}]} {
    %c0 = arith.constant 0 : index
    %c0_0 = arith.constant 0 : index
    %0 = vector.load %arg1[%c0, %c0_0] : memref<8x16xf32, #tpu.memory_space<vmem>>, vector<8x16xf32>
    %c0_1 = arith.constant 0 : index
    %c0_2 = arith.constant 0 : index
    %1 = vector.load %arg3[%c0_1, %c0_2] : memref<4x128xf32, #tpu.memory_space<vmem>>, vector<4x128xf32>
    %c0_3 = arith.constant 0 : index
    %c0_4 = arith.constant 0 : index
    %c0_5 = arith.constant 0 : index
    %2 = vector.load %arg2[%c0_3, %c0_4, %c0_5] : memref<4x128x128xf32, #tpu.memory_space<vmem>>, vector<1x16x128xf32>
    %3 = vector.shape_cast %2 : vector<1x16x128xf32> to vector<16x128xf32>
    %cst = arith.constant dense<0.000000e+00> : vector<8x128xf32>
    %4 = tpu.matmul %0, %3, %cst {dimension_numbers = #tpu.dot_dimension_numbers<[1], [0], [0], [1], [0, 0, 1, 1], [], []>} : vector<8x16xf32>, vector<16x128xf32>, vector<8x128xf32> -> vector<8x128xf32>
    %5 = vector.extract_strided_slice %1 {offsets = [0, 0], sizes = [1, 128], strides = [1, 1]} : vector<4x128xf32> to vector<1x128xf32>
    %6 = vector.broadcast %5 : vector<1x128xf32> to vector<8x128xf32>
    %7 = arith.addf %4, %6 : vector<8x128xf32>
    %cst_6 = arith.constant 0.000000e+00 : f32
    %8 = vector.broadcast %cst_6 : f32 to vector<8x128xf32>
    %9 = arith.maximumf %7, %8 : vector<8x128xf32>
    %c1 = arith.constant 1 : index
    %c0_7 = arith.constant 0 : index
    %c0_8 = arith.constant 0 : index
    %10 = vector.load %arg2[%c1, %c0_7, %c0_8] : memref<4x128x128xf32, #tpu.memory_space<vmem>>, vector<1x128x128xf32>
    %11 = vector.shape_cast %10 : vector<1x128x128xf32> to vector<128x128xf32>
    %cst_9 = arith.constant dense<0.000000e+00> : vector<8x128xf32>
    %12 = tpu.matmul %9, %11, %cst_9 {dimension_numbers = #tpu.dot_dimension_numbers<[1], [0], [0], [1], [0, 0, 1, 1], [], []>} : vector<8x128xf32>, vector<128x128xf32>, vector<8x128xf32> -> vector<8x128xf32>
    %13 = vector.extract_strided_slice %1 {offsets = [1, 0], sizes = [1, 128], strides = [1, 1]} : vector<4x128xf32> to vector<1x128xf32>
    %14 = vector.broadcast %13 : vector<1x128xf32> to vector<8x128xf32>
    %15 = arith.addf %12, %14 : vector<8x128xf32>
    %cst_10 = arith.constant 0.000000e+00 : f32
    %16 = vector.broadcast %cst_10 : f32 to vector<8x128xf32>
    %17 = arith.maximumf %15, %16 : vector<8x128xf32>
    %c2 = arith.constant 2 : index
    %c0_11 = arith.constant 0 : index
    %c0_12 = arith.constant 0 : index
    %18 = vector.load %arg2[%c2, %c0_11, %c0_12] : memref<4x128x128xf32, #tpu.memory_space<vmem>>, vector<1x128x128xf32>
    %19 = vector.shape_cast %18 : vector<1x128x128xf32> to vector<128x128xf32>
    %cst_13 = arith.constant dense<0.000000e+00> : vector<8x128xf32>
    %20 = tpu.matmul %17, %19, %cst_13 {dimension_numbers = #tpu.dot_dimension_numbers<[1], [0], [0], [1], [0, 0, 1, 1], [], []>} : vector<8x128xf32>, vector<128x128xf32>, vector<8x128xf32> -> vector<8x128xf32>
    %21 = vector.extract_strided_slice %1 {offsets = [2, 0], sizes = [1, 128], strides = [1, 1]} : vector<4x128xf32> to vector<1x128xf32>
    %22 = vector.broadcast %21 : vector<1x128xf32> to vector<8x128xf32>
    %23 = arith.addf %20, %22 : vector<8x128xf32>
    %cst_14 = arith.constant 0.000000e+00 : f32
    %24 = vector.broadcast %cst_14 : f32 to vector<8x128xf32>
    %25 = arith.maximumf %23, %24 : vector<8x128xf32>
    %c3 = arith.constant 3 : index
    %c0_15 = arith.constant 0 : index
    %c0_16 = arith.constant 0 : index
    %26 = vector.load %arg2[%c3, %c0_15, %c0_16] : memref<4x128x128xf32, #tpu.memory_space<vmem>>, vector<1x128x128xf32>
    %27 = vector.shape_cast %26 : vector<1x128x128xf32> to vector<128x128xf32>
    %cst_17 = arith.constant dense<0.000000e+00> : vector<8x128xf32>
    %28 = tpu.matmul %25, %27, %cst_17 {dimension_numbers = #tpu.dot_dimension_numbers<[1], [0], [0], [1], [0, 0, 1, 1], [], []>} : vector<8x128xf32>, vector<128x128xf32>, vector<8x128xf32> -> vector<8x128xf32>
    %29 = vector.extract_strided_slice %1 {offsets = [3, 0], sizes = [1, 128], strides = [1, 1]} : vector<4x128xf32> to vector<1x128xf32>
    %30 = vector.broadcast %29 : vector<1x128xf32> to vector<8x128xf32>
    %31 = arith.addf %28, %30 : vector<8x128xf32>
    %32 = vector.extract_strided_slice %31 {offsets = [0, 0], sizes = [8, 8], strides = [1, 1]} : vector<8x128xf32> to vector<8x8xf32>
    %c0_18 = arith.constant 0 : index
    %c0_19 = arith.constant 0 : index
    %33 = vector.load %arg4[%c0_18, %c0_19] : memref<8x8xf32, #tpu.memory_space<vmem>>, vector<8x8xf32>
    tpu.vector_store %arg4[%c0_18, %c0_19], %32 {strides = array<i32>} : memref<8x8xf32, #tpu.memory_space<vmem>>, vector<8x8xf32>,
    return
  }
  func.func @transform_0(%arg0: i32) -> (i32, i32) {
    %c0_i32 = arith.constant 0 : i32
    %c0_i32_0 = arith.constant 0 : i32
    return %arg0, %c0_i32 : i32, i32
  }
  func.func @transform_1(%arg0: i32) -> (i32, i32, i32) {
    %c0_i32 = arith.constant 0 : i32
    %c0_i32_0 = arith.constant 0 : i32
    %c0_i32_1 = arith.constant 0 : i32
    %c0_i32_2 = arith.constant 0 : i32
    return %c0_i32, %c0_i32_0, %c0_i32_1 : i32, i32, i32
  }
  func.func @transform_2(%arg0: i32) -> (i32, i32) {
    %c0_i32 = arith.constant 0 : i32
    %c0_i32_0 = arith.constant 0 : i32
    %c0_i32_1 = arith.constant 0 : i32
    return %c0_i32, %c0_i32_0 : i32, i32
  }
  func.func @transform_3(%arg0: i32) -> (i32, i32) {
    %c0_i32 = arith.constant 0 : i32
    %c0_i32_0 = arith.constant 0 : i32
    return %arg0, %c0_i32 : i32, i32
  }
}

</mosaic_0001>

<bundles_post_ra>
// kernel: tpu_custom_call.1
= control target key start
LH: loop header
LB: loop body
LE: loop exit
PB: predicated region body
PF: predicated region fallthrough
CT: control target
= control target key end

     0   :  { %8 = vsyncpa [#allocation3], 0  ;;  %s377_s0 = inlined_call_operand.hbm [shape: f32[8,16], index: 0, kind: input, shape index: {}]   ;;  %s378_s1 = inlined_call_operand.hbm [shape: f32[4,128,128], index: 1, kind: input, shape index: {}]   ;;  %s379_s2 = inlined_call_operand.hbm [shape: f32[4,128], index: 2, kind: input, shape index: {}]   ;;  %s380_s3 = inlined_call_operand.hbm [shape: f32[8,8], index: 3, kind: output, shape index: {}]  }
   0x1   :  { %9 = vsyncpa [#allocation6], 0  ;;  %s26_s14 = sshll.u32 %s378_s1, 4  ;;  %s27_s14 = int_to_ptr.hbm [resolvable:$true] %s26_s14 }
   0x2   :  { %10 = vsyncpa [#allocation4], 0  ;;  %s333_s15 = smov [#allocation5]   ;;  %s16_s19 = sshll.u32 %s377_s0, 4  ;;  %s17_s19 = int_to_ptr.hbm [resolvable:$true] %s16_s19 }
   0x3   :  { %s28_s16 = sshll.u32 %s333_s15, 4  ;;  %s334_s20 = smov 128   ;;  %s29_s16 = int_to_ptr.vmem [resolvable:$true] %s28_s16 }
   0x4   :  { %s335_s21 = smov 8   ;;  %s336_s22 = smov [#allocation2]  }
   0x5   :  { %34 = dma.hbm_to_vmem [thread:$0]  %s27_s14, 8192, %s29_s16, [#allocation6], %s334_s20, %s334_s20, %s335_s21  }
   0x6   :  { %s18_s23 = sshll.u32 %s336_s22, 4  ;;  %s40_s26 = sshll.u32 %s379_s2, 4  ;;  %s19_s23 = int_to_ptr.vmem [resolvable:$true] %s18_s23  ;;  %s41_s26 = int_to_ptr.hbm [resolvable:$true] %s40_s26 }
   0x7   :  { %21 = dma.hbm_to_vmem [thread:$0]  %s17_s19, 128, %s19_s23, [#allocation3]  }
   0x8   :  { %s337_s1 = smov [#allocation7]  }
   0x9   :  { %s42_s27 = sshll.u32 %s337_s1, 4  ;;  %s43_s27 = int_to_ptr.vmem [resolvable:$true] %s42_s27 }
   0xa   :  { %45 = dma.hbm_to_vmem [thread:$0]  %s41_s26, 64, %s43_s27, [#allocation6]  }
   0xb   :  { %327 = dma.done.wait [#allocation3], 128  }
   0xc   :  { %328 = vsyncadd [#allocation3], 4294967168 }
   0xd   :  { %329 = dma.done.wait [#allocation6], 8256  }
   0xe   :  { %330 = vsyncadd [#allocation6], 4294959040  ;;  %v61_v0 = vld [vmem:[#allocation5 + $0x8] sm:$0xff]  ;;  %v60_v1 = vld [vmem:[#allocation5] sm:$0xff]  ;;  %vm63_vm0 = vcmask 130048   ;;  %s338_s0 = smov [#allocation8]  }
   0xf   :  { %81 = vmatpush.msra.mxu0 %v61_v0  ;;  %v58_v2 = vld [vmem:[#allocation2] sm:$0xff]  ;;  %v103_v4 = vld [vmem:[#allocation5 + $0xf0] sm:$0xff]  ;;  %v102_v5 = vld [vmem:[#allocation5 + $0xe8] sm:$0xff]  ;;  %s211_s2 = sshll.u32 %s338_s0, 4  ;;  %s213_s30 = sshll.u32 %s380_s3, 4  ;;  %vm204_vm1 = vcmask 64512   ;;  %s212_s2 = int_to_ptr.vmem [resolvable:$true] %s211_s2  ;;  %s214_s30 = int_to_ptr.hbm [resolvable:$true] %s213_s30 }
  0x10   :  { %v104_v3 = vld [vmem:[#allocation5 + $0xf8] sm:$0xff]  ;;  %v101_v6 = vld [vmem:[#allocation5 + $0xe0] sm:$0xff]  ;;  %v99_v8 = vld [vmem:[#allocation5 + $0xd0] sm:$0xff] }
  0x11   :  { %106 = vmatpush.msra.mxu1 %v104_v3  ;;  %82 = vmatpush.msra.mxu0 %v60_v1  ;;  %v100_v7 = vld [vmem:[#allocation5 + $0xd8] sm:$0xff]  ;;  %v98_v9 = vld [vmem:[#allocation5 + $0xc8] sm:$0xff]  ;;  %v97_v10 = vld [vmem:[#allocation5 + $0xc0] sm:$0xff] }
  0x12   :  { %224 = vmatmul.msk.f32.vlgmr.msra.gmra.mxu0 %vm63_vm0, %v58_v2  ;;  %v96_v11 = vld [vmem:[#allocation5 + $0xb8] sm:$0xff]  ;;  %v95_v12 = vld [vmem:[#allocation5 + $0xb0] sm:$0xff]  ;;  %v94_v13 = vld [vmem:[#allocation5 + $0xa8] sm:$0xff] }
  0x13   :  { %107 = vmatpush.msra.mxu1 %v103_v4  ;;  %v93_v14 = vld [vmem:[#allocation5 + $0xa0] sm:$0xff]  ;;  %v92_v15 = vld [vmem:[#allocation5 + $0x98] sm:$0xff]  ;;  %v91_v16 = vld [vmem:[#allocation5 + $0x90] sm:$0xff] }
  0x14   :  { %v90_v17 = vld [vmem:[#allocation5 + $0x88] sm:$0xff]  ;;  %v89_v18 = vld [vmem:[#allocation5 + $0x80] sm:$0xff]  ;;  %v143_v19 = vld [vmem:[#allocation5 + $0x178] sm:$0xff] }
  0x15   :  { %108 = vmatpush.msra.mxu1 %v102_v5  ;;  %v142_v20 = vld [vmem:[#allocation5 + $0x170] sm:$0xff]  ;;  %145 = vmatpush.msra.mxu2 %v143_v19  ;;  %v141_v21 = vld [vmem:[#allocation5 + $0x168] sm:$0xff]  ;;  %v140_v22 = vld [vmem:[#allocation5 + $0x160] sm:$0xff] }
  0x16   :  { %v139_v23 = vld [vmem:[#allocation5 + $0x158] sm:$0xff]  ;;  %v138_v24 = vld [vmem:[#allocation5 + $0x150] sm:$0xff]  ;;  %v137_v25 = vld [vmem:[#allocation5 + $0x148] sm:$0xff] }
  0x17   :  { %109 = vmatpush.msra.mxu1 %v101_v6  ;;  %146 = vmatpush.msra.mxu2 %v142_v20  ;;  %v136_v26 = vld [vmem:[#allocation5 + $0x140] sm:$0xff]  ;;  %v135_v27 = vld [vmem:[#allocation5 + $0x138] sm:$0xff]  ;;  %v134_v28 = vld [vmem:[#allocation5 + $0x130] sm:$0xff] }
  0x18   :  { %v133_v29 = vld [vmem:[#allocation5 + $0x128] sm:$0xff]  ;;  %v132_v30 = vld [vmem:[#allocation5 + $0x120] sm:$0xff]  ;;  %v131_v32 = vld [vmem:[#allocation5 + $0x118] sm:$0xff] }
  0x19   :  { %110 = vmatpush.msra.mxu1 %v100_v7  ;;  %147 = vmatpush.msra.mxu2 %v141_v21  ;;  %v368_v31 = vld [vmem:[#allocation7] sm:$0xf]  ;;  %v130_v37 = vld [vmem:[#allocation5 + $0x110] sm:$0xff]  ;;  %v129_v38 = vld [vmem:[#allocation5 + $0x108] sm:$0xff] }
  0x1a   :  { %v62_v33 = vperm.slane %v368_v31, 0  ;;  %v128_v39 = vld [vmem:[#allocation5 + $0x100] sm:$0xff]  ;;  %v182_v40 = vld [vmem:[#allocation5 + $0x1f8] sm:$0xff]  ;;  %v181_v41 = vld [vmem:[#allocation5 + $0x1f0] sm:$0xff]  ;;  %v105_v53 = vperm.slane %v368_v31, 1  ;;  %v144_v60 = vperm.slane %v368_v31, 2 }
  0x1b   :  { %111 = vmatpush.msra.mxu1 %v99_v8  ;;  %148 = vmatpush.msra.mxu2 %v140_v22  ;;  %v180_v42 = vld [vmem:[#allocation5 + $0x1e8] sm:$0xff]  ;;  %v179_v43 = vld [vmem:[#allocation5 + $0x1e0] sm:$0xff]  ;;  %v178_v44 = vld [vmem:[#allocation5 + $0x1d8] sm:$0xff]  ;;  %v183_v0 = vperm.slane %v368_v31, 3 }
  0x1c   :  { %184 = vmatpush.msra.mxu3 %v182_v40  ;;  %v177_v45 = vld [vmem:[#allocation5 + $0x1d0] sm:$0xff]  ;;  %v176_v46 = vld [vmem:[#allocation5 + $0x1c8] sm:$0xff]  ;;  %v175_v47 = vld [vmem:[#allocation5 + $0x1c0] sm:$0xff] }
  0x1d   :  { %112 = vmatpush.msra.mxu1 %v98_v9  ;;  %149 = vmatpush.msra.mxu2 %v139_v23  ;;  %v174_v48 = vld [vmem:[#allocation5 + $0x1b8] sm:$0xff]  ;;  %v173_v49 = vld [vmem:[#allocation5 + $0x1b0] sm:$0xff]  ;;  %v172_v50 = vld [vmem:[#allocation5 + $0x1a8] sm:$0xff] }
  0x1e   :  { %185 = vmatpush.msra.mxu3 %v181_v41  ;;  %v171_v51 = vld [vmem:[#allocation5 + $0x1a0] sm:$0xff]  ;;  %v170_v52 = vld [vmem:[#allocation5 + $0x198] sm:$0xff]  ;;  %v169_v57 = vld [vmem:[#allocation5 + $0x190] sm:$0xff] }
  0x1f   :  { %113 = vmatpush.msra.mxu1 %v97_v10  ;;  %150 = vmatpush.msra.mxu2 %v138_v24  ;;  %v168_v58 = vld [vmem:[#allocation5 + $0x188] sm:$0xff]  ;;  %v167_v59 = vld [vmem:[#allocation5 + $0x180] sm:$0xff] }
  0x20   :  { %186 = vmatpush.msra.mxu3 %v180_v42 }
  0x21   :  { %114 = vmatpush.msra.mxu1 %v96_v11  ;;  %151 = vmatpush.msra.mxu2 %v137_v25 }
  0x22   :  { %187 = vmatpush.msra.mxu3 %v179_v43 }
  0x23   :  { %115 = vmatpush.msra.mxu1 %v95_v12  ;;  %152 = vmatpush.msra.mxu2 %v136_v26 }
  0x24   :  { %188 = vmatpush.msra.mxu3 %v178_v44 }
  0x25   :  { %116 = vmatpush.msra.mxu1 %v94_v13  ;;  %153 = vmatpush.msra.mxu2 %v135_v27 }
  0x26   :  { %189 = vmatpush.msra.mxu3 %v177_v45 }
  0x27   :  { %117 = vmatpush.msra.mxu1 %v93_v14  ;;  %154 = vmatpush.msra.mxu2 %v134_v28 }
  0x28   :  { %190 = vmatpush.msra.mxu3 %v176_v46 }
  0x29   :  { %118 = vmatpush.msra.mxu1 %v92_v15  ;;  %155 = vmatpush.msra.mxu2 %v133_v29 }
  0x2a   :  { %191 = vmatpush.msra.mxu3 %v175_v47 }
  0x2b   :  { %119 = vmatpush.msra.mxu1 %v91_v16  ;;  %156 = vmatpush.msra.mxu2 %v132_v30 }
  0x2c   :  { %192 = vmatpush.msra.mxu3 %v174_v48 }
  0x2d   :  { %120 = vmatpush.msra.mxu1 %v90_v17  ;;  %157 = vmatpush.msra.mxu2 %v131_v32 }
  0x2e   :  { %193 = vmatpush.msra.mxu3 %v173_v49 }
  0x2f   :  { %121 = vmatpush.msra.mxu1 %v89_v18  ;;  %158 = vmatpush.msra.mxu2 %v130_v37 }
  0x30   :  { %194 = vmatpush.msra.mxu3 %v172_v50 }
  0x31   :  { %159 = vmatpush.msra.mxu2 %v129_v38 }
  0x32   :  { %195 = vmatpush.msra.mxu3 %v171_v51 }
  0x33   :  { %160 = vmatpush.msra.mxu2 %v128_v39 }
  0x34   :  { %196 = vmatpush.msra.mxu3 %v170_v52 }
  0x36   :  { %197 = vmatpush.msra.mxu3 %v169_v57 }
  0x38   :  { %198 = vmatpush.msra.mxu3 %v168_v58 }
  0x3a   :  { %199 = vmatpush.msra.mxu3 %v167_v59 }
  0x8f   :  { %v84_v34 = vpop.f32.mrf.mxu0 }
  0x90   :  { %v85_v35 = vadd.f32 %v84_v34, %v62_v33 }
  0x92   :  { %v87_v36 = vmax.f32 %v85_v35, 0.0 }
  0x94   :  { %122 = vmatmul.f32.vlgmr.msra.gmra.mxu1 %v87_v36 }
 0x111   :  { %v123_v54 = vpop.f32.mrf.mxu1 }
 0x112   :  { %v124_v55 = vadd.f32 %v123_v54, %v105_v53 }
 0x114   :  { %v126_v56 = vmax.f32 %v124_v55, 0.0 }
 0x116   :  { %161 = vmatmul.f32.vlgmr.msra.gmra.mxu2 %v126_v56 }
 0x199   :  { %v162_v61 = vpop.f32.mrf.mxu2 }
 0x19a   :  { %v163_v62 = vadd.f32 %v162_v61, %v144_v60 }
 0x19c   :  { %v165_v63 = vmax.f32 %v163_v62, 0.0 }
 0x19e   :  { %200 = vmatmul.f32.vlgmr.msra.gmra.mxu3 %v165_v63 }
 0x221   :  { %v201_v1 = vpop.f32.mrf.mxu3 }
 0x222   :  { %v202_v2 = vadd.f32 %v201_v1, %v183_v0 }
 0x224   :  { %205 = vst.msk [vmem:[#allocation8] sm:$0xff] %vm204_vm1, %v202_v2 }
 0x225   :  { %216 = dma.vmem_to_hbm [thread:$0]  %s212_s2, 128, %s214_s30, [#allocation4]  }
 0x226   :  { %331 = dma.done.wait [#allocation4], 128  }
 0x227   :  { %332 = vsyncadd [#allocation4], 4294967168 }
 0x228   :  { %221 = vsyncpa [#allocation3], 1 }
 0x229   :  { %222 = vsyncpa [#allocation6], 1 }
 0x22a   :  { %223 = vsyncpa [#allocation4], 1 }

</bundles_post_ra>
